<compile_context>
chip_gen: v7x
topology: tpu7x:2x2x1
jax: 0.10.0
libtpu: 0.0.40
codegen_flags: <defaults>
</compile_context>

<pallas_src>
import functools

import jax
import jax.numpy as jnp
from jax.experimental import pallas as pl
from jax.experimental.pallas import tpu as pltpu


LN_EPS = 1e-5  # PyTorch nn.LayerNorm default


def _round_up(x, m):
    return (x + m - 1) // m * m


def _vmem_plan():
    """Per-generation (tile budget bytes, scoped VMEM limit bytes, max tile rows)."""
    try:
        cap = pltpu.get_tpu_info().vmem_capacity_bytes
    except Exception:  # not on TPU / API drift -> conservative (v7x-safe) defaults
        cap = 64 * 1024 * 1024
    if cap >= 100 * 1024 * 1024:
        # v5e / v6e: 128 MiB physical VMEM -> big tiles amortize per-step overhead.
        return 48 * 1024 * 1024, 96 * 1024 * 1024, 2048
    # v7x: 64 MiB physical VMEM (2 TensorCores) -> stay conservative.
    return 20 * 1024 * 1024, 32 * 1024 * 1024, 1024


def _patchify_kernel(p_ref, w_ref, params_ref, o_ref, *, n_true):
    """p: [TM,K] bf16, w: [K,Np] bf16, params: [3,Np] f32 (bias,gamma,beta), o: [TM,N]."""
    # Patch-embedding "conv" == matmul on the MXU (bf16 operands, f32 accumulate).
    y = jnp.dot(p_ref[...], w_ref[...], preferred_element_type=jnp.float32)
    y = y + params_ref[0:1, :]  # bias; padded channels carry bias 0

    # Fused single-pass LayerNorm over the true out_channels. Padded channels
    # (index >= n_true) are exactly zero (zero weight cols + zero bias), so sums
    # over the padded lane width equal sums over the true channels; divide by
    # the true channel count.
    inv_n = 1.0 / n_true
    s1 = jnp.sum(y, axis=-1, keepdims=True)
    s2 = jnp.sum(y * y, axis=-1, keepdims=True)
    mean = s1 * inv_n
    var = jnp.maximum(s2 * inv_n - mean * mean, 0.0)
    inv = jax.lax.rsqrt(var + LN_EPS)
    y = (y - mean) * inv * params_ref[1:2, :] + params_ref[2:3, :]

    # Store only the true channels (a no-op slice when C_out % 128 == 0). This
    # lets the kernel emit [M, C_out] directly, avoiding a post-kernel crop pass.
    o_ref[...] = y[:, : o_ref.shape[-1]].astype(o_ref.dtype)


def patchify_forward(x, conv_w, conv_b, ln_gamma, ln_beta, patch_size,
                     out_dtype=jnp.bfloat16):
    """x: [B, C_in, H, W] (NCHW). Returns [B, num_patches, C_out] in `out_dtype`."""
    B, C_in, H, W = x.shape
    P = patch_size
    assert H % P == 0 and W % P == 0
    Hp, Wp = H // P, W // P
    num_patches = Hp * Wp
    C_out = conv_w.shape[0]

    # --- glue: im2col in bf16 so the transpose only moves 2-byte elements ------
    # TODO(synk): fold this relayout into the kernel (grid over (B, Hp) reading x
    # in NCHW directly + in-VMEM flatten) to remove this extra HBM pass entirely.
    x_bf = x.astype(jnp.bfloat16)
    patches = x_bf.reshape(B, C_in, Hp, P, Wp, P)
    patches = jnp.transpose(patches, (0, 2, 4, 1, 3, 5))  # (C_in, kh, kw) order
    patches = patches.reshape(B * num_patches, C_in * P * P)

    M, K = patches.shape
    N = C_out
    N_pad = _round_up(N, 128)  # lane-dense MXU columns
    out_bytes = jnp.dtype(out_dtype).itemsize

    # conv weight [C_out, C_in, P, P] -> [K, N_pad] bf16 with zero-padded columns.
    w_mat = jnp.transpose(conv_w.reshape(C_out, K)).astype(jnp.bfloat16)
    if N_pad != N:
        w_mat = jnp.zeros((K, N_pad), jnp.bfloat16).at[:, :N].set(w_mat)

    # bias / gamma / beta packed into a single resident (3, N_pad) f32 operand
    # (one DMA + one double-buffer instead of three).
    params = jnp.zeros((3, N_pad), jnp.float32)
    params = params.at[0, :N].set(conv_b.astype(jnp.float32))
    params = params.at[1, :N].set(ln_gamma.astype(jnp.float32))
    params = params.at[2, :N].set(ln_beta.astype(jnp.float32))

    # --- tile the rows (M) axis against the per-generation VMEM budget ---------
    budget, vmem_limit, tm_cap = _vmem_plan()
    # Constant-index operands are still double-buffered by the pipeline, so count
    # them twice (keeps v7x's 64 MiB honest).  TODO(synk): pl.Buffered(1) on the
    # weight/params specs would reclaim that copy.
    resident = 2 * (K * N_pad * 2 + 3 * N_pad * 4)
    per_row = 2 * (K * 2 + N * out_bytes)  # bf16 patch tile in + out tile, 2 bufs each
    tm = max(16, (budget - resident) // max(per_row, 1))
    tm = min(tm, tm_cap, _round_up(M, 16))
    if M // 8 >= 16:
        # Keep >= ~8 grid steps so both v7x TensorCores get work and the DMA
        # pipeline has iterations to overlap.
        tm = min(tm, (M // 8) // 16 * 16)
    tm = max(16, (tm // 16) * 16)  # bf16 sublane packing: 16 rows per vreg

    grid = (pl.cdiv(M, tm),)

    cost = pl.CostEstimate(
        flops=2 * M * K * N_pad,
        transcendentals=M,  # one rsqrt per row
        bytes_accessed=M * K * 2 + K * N_pad * 2 + 3 * N_pad * 4 + M * N * out_bytes,
    )

    out = pl.pallas_call(
        functools.partial(_patchify_kernel, n_true=float(N)),
        out_shape=jax.ShapeDtypeStruct((M, N), out_dtype),
        grid=grid,
        in_specs=[
            pl.BlockSpec((tm, K), lambda i: (i, 0)),       # patches: streamed tiles
            pl.BlockSpec((K, N_pad), lambda i: (0, 0)),    # weight: VMEM-resident
            pl.BlockSpec((3, N_pad), lambda i: (0, 0)),    # packed bias/gamma/beta
        ],
        out_specs=pl.BlockSpec((tm, N), lambda i: (i, 0)),
        compiler_params=pltpu.CompilerParams(
            dimension_semantics=("parallel",),             # megacore: shard rows
            vmem_limit_bytes=vmem_limit,
        ),
        cost_estimate=cost,
    )(patches, w_mat, params)

    return out.reshape(B, num_patches, N)


def _reference(x, conv_w, conv_b, ln_gamma, ln_beta, patch_size):
    """Pure-JAX f32 reference of the PyTorch forward for a sanity check."""
    y = jax.lax.conv_general_dilated(
        x, conv_w,
        window_strides=(patch_size, patch_size),
        padding="VALID",
        dimension_numbers=("NCHW", "OIHW", "NCHW"),
    ) + conv_b[None, :, None, None]
    B, C, h, w = y.shape
    y = jnp.transpose(y.reshape(B, C, h * w), (0, 2, 1))  # b (h w) c
    mean = jnp.mean(y, axis=-1, keepdims=True)
    var = jnp.mean((y - mean) ** 2, axis=-1, keepdims=True)
    return (y - mean) / jnp.sqrt(var + LN_EPS) * ln_gamma + ln_beta


if __name__ == "__main__":
    # Small shapes consistent with the module.
    image_size = 16
    patch_size = 4
    in_channels = 4
    out_channels = 32
    batch = 2

    key = jax.random.PRNGKey(0)
    kx, kw, kb, kg, kbe = jax.random.split(key, 5)

    x = jax.random.normal(kx, (batch, in_channels, image_size, image_size), jnp.float32)
    # Deterministic synthetic parameters (shapes from nn.Conv2d / nn.LayerNorm).
    conv_w = 0.1 * jax.random.normal(
        kw, (out_channels, in_channels, patch_size, patch_size), jnp.float32)
    conv_b = 0.1 * jax.random.normal(kb, (out_channels,), jnp.float32)
    ln_gamma = 1.0 + 0.05 * jax.random.normal(kg, (out_channels,), jnp.float32)
    ln_beta = 0.05 * jax.random.normal(kbe, (out_channels,), jnp.float32)

    out = patchify_forward(x, conv_w, conv_b, ln_gamma, ln_beta, patch_size)
    out = jax.block_until_ready(out)

    ref = _reference(x, conv_w, conv_b, ln_gamma, ln_beta, patch_size)
    assert out.shape == (batch, (image_size // patch_size) ** 2, out_channels)
    out_f32 = out.astype(jnp.float32)
    # bf16 MXU operands + bf16 output (f32 accumulation / LayerNorm) -> loose tol.
    assert jnp.allclose(out_f32, ref, atol=3e-2, rtol=3e-2), \
        float(jnp.max(jnp.abs(out_f32 - ref)))

    print("KERNEL_OK")
</pallas_src>

<mosaic_0001>
module attributes {stable_mosaic.version = 11 : i64} {
  func.func @_patchify_kernel(%arg0: i32, %arg1: memref<32x64xbf16, #tpu.memory_space<vmem>>, %arg2: memref<64x128xbf16, #tpu.memory_space<vmem>>, %arg3: memref<3x128xf32, #tpu.memory_space<vmem>>, %arg4: memref<32x32xbf16, #tpu.memory_space<vmem>>) attributes {dimension_semantics = [#tpu.dimension_semantics<parallel>], iteration_bounds = array<i64: 1>, scalar_prefetch = 0 : i64, scratch_operands = 0 : i64, tpu.core_type = #tpu.core_type<tc>, window_params = [{transform_indices = @transform_0, window_bounds = array<i64: 32, 64>}, {pipeline_mode = #tpu.pipeline_mode<synchronous>, transform_indices = @transform_1, window_bounds = array<i64: 64, 128>}, {pipeline_mode = #tpu.pipeline_mode<synchronous>, transform_indices = @transform_2, window_bounds = array<i64: 3, 128>}, {transform_indices = @transform_3, window_bounds = array<i64: 32, 32>}]} {
    %c0 = arith.constant 0 : index
    %c0_0 = arith.constant 0 : index
    %0 = vector.load %arg1[%c0, %c0_0] : memref<32x64xbf16, #tpu.memory_space<vmem>>, vector<32x64xbf16>
    %c0_1 = arith.constant 0 : index
    %c0_2 = arith.constant 0 : index
    %1 = vector.load %arg2[%c0_1, %c0_2] : memref<64x128xbf16, #tpu.memory_space<vmem>>, vector<64x128xbf16>
    %cst = arith.constant dense<0.000000e+00> : vector<32x128xf32>
    %2 = tpu.matmul %0, %1, %cst {dimension_numbers = #tpu.dot_dimension_numbers<[1], [0], [0], [1], [0, 0, 1, 1], [], []>} : vector<32x64xbf16>, vector<64x128xbf16>, vector<32x128xf32> -> vector<32x128xf32>
    %c0_3 = arith.constant 0 : index
    %c0_4 = arith.constant 0 : index
    %3 = vector.load %arg3[%c0_3, %c0_4] : memref<3x128xf32, #tpu.memory_space<vmem>>, vector<1x128xf32>
    %4 = vector.broadcast %3 : vector<1x128xf32> to vector<32x128xf32>
    %5 = arith.addf %2, %4 : vector<32x128xf32>
    %cst_5 = arith.constant dense<0.000000e+00> : vector<32xf32>
    %6 = vector.multi_reduction <add>, %5, %cst_5 [1] : vector<32x128xf32> to vector<32xf32>
    %7 = vector.shape_cast %6 : vector<32xf32> to vector<32x1xf32>
    %8 = arith.mulf %5, %5 : vector<32x128xf32>
    %cst_6 = arith.constant dense<0.000000e+00> : vector<32xf32>
    %9 = vector.multi_reduction <add>, %8, %cst_6 [1] : vector<32x128xf32> to vector<32xf32>
    %10 = vector.shape_cast %9 : vector<32xf32> to vector<32x1xf32>
    %cst_7 = arith.constant 3.125000e-02 : f32
    %11 = vector.broadcast %cst_7 : f32 to vector<32x1xf32>
    %12 = arith.mulf %7, %11 : vector<32x1xf32>
    %cst_8 = arith.constant 3.125000e-02 : f32
    %13 = vector.broadcast %cst_8 : f32 to vector<32x1xf32>
    %14 = arith.mulf %10, %13 : vector<32x1xf32>
    %15 = arith.mulf %12, %12 : vector<32x1xf32>
    %16 = arith.subf %14, %15 : vector<32x1xf32>
    %cst_9 = arith.constant 0.000000e+00 : f32
    %17 = vector.broadcast %cst_9 : f32 to vector<32x1xf32>
    %18 = arith.maximumf %16, %17 : vector<32x1xf32>
    %cst_10 = arith.constant 9.99999974E-6 : f32
    %19 = vector.broadcast %cst_10 : f32 to vector<32x1xf32>
    %20 = arith.addf %18, %19 : vector<32x1xf32>
    %21 = math.rsqrt %20 : vector<32x1xf32>
    %22 = vector.broadcast %12 : vector<32x1xf32> to vector<32x128xf32>
    %23 = arith.subf %5, %22 : vector<32x128xf32>
    %24 = vector.broadcast %21 : vector<32x1xf32> to vector<32x128xf32>
    %25 = arith.mulf %23, %24 : vector<32x128xf32>
    %c1 = arith.constant 1 : index
    %c0_11 = arith.constant 0 : index
    %26 = vector.load %arg3[%c1, %c0_11] : memref<3x128xf32, #tpu.memory_space<vmem>>, vector<1x128xf32>
    %27 = vector.broadcast %26 : vector<1x128xf32> to vector<32x128xf32>
    %28 = arith.mulf %25, %27 : vector<32x128xf32>
    %c2 = arith.constant 2 : index
    %c0_12 = arith.constant 0 : index
    %29 = vector.load %arg3[%c2, %c0_12] : memref<3x128xf32, #tpu.memory_space<vmem>>, vector<1x128xf32>
    %30 = vector.broadcast %29 : vector<1x128xf32> to vector<32x128xf32>
    %31 = arith.addf %28, %30 : vector<32x128xf32>
    %32 = vector.extract_strided_slice %31 {offsets = [0, 0], sizes = [32, 32], strides = [1, 1]} : vector<32x128xf32> to vector<32x32xf32>
    %33 = arith.truncf %32 : vector<32x32xf32> to vector<32x32xbf16>
    %c0_13 = arith.constant 0 : index
    %c0_14 = arith.constant 0 : index
    %34 = vector.load %arg4[%c0_13, %c0_14] : memref<32x32xbf16, #tpu.memory_space<vmem>>, vector<32x32xbf16>
    tpu.vector_store %arg4[%c0_13, %c0_14], %33 {strides = array<i32>} : memref<32x32xbf16, #tpu.memory_space<vmem>>, vector<32x32xbf16>,
    return
  }
  func.func @transform_0(%arg0: i32) -> (i32, i32) {
    %c0_i32 = arith.constant 0 : i32
    %c0_i32_0 = arith.constant 0 : i32
    return %arg0, %c0_i32 : i32, i32
  }
  func.func @transform_1(%arg0: i32) -> (i32, i32) {
    %c0_i32 = arith.constant 0 : i32
    %c0_i32_0 = arith.constant 0 : i32
    %c0_i32_1 = arith.constant 0 : i32
    return %c0_i32, %c0_i32_0 : i32, i32
  }
  func.func @transform_2(%arg0: i32) -> (i32, i32) {
    %c0_i32 = arith.constant 0 : i32
    %c0_i32_0 = arith.constant 0 : i32
    %c0_i32_1 = arith.constant 0 : i32
    return %c0_i32, %c0_i32_0 : i32, i32
  }
  func.func @transform_3(%arg0: i32) -> (i32, i32) {
    %c0_i32 = arith.constant 0 : i32
    %c0_i32_0 = arith.constant 0 : i32
    return %arg0, %c0_i32 : i32, i32
  }
}

</mosaic_0001>

<bundles_post_ra>
// kernel: tpu_custom_call.1
= control target key start
LH: loop header
LB: loop body
LE: loop exit
PB: predicated region body
PF: predicated region fallthrough
CT: control target
= control target key end

     0   :  { %8 = vsyncpa [#allocation3], 0  ;;  %s483_s0 = inlined_call_operand.hbm [shape: bf16[32,64], index: 0, kind: input, shape index: {}]   ;;  %s484_s1 = inlined_call_operand.hbm [shape: bf16[64,128], index: 1, kind: input, shape index: {}]   ;;  %s485_s2 = inlined_call_operand.vmem [shape: f32[3,128], index: 2, kind: input, shape index: {}]   ;;  %s486_s3 = inlined_call_operand.hbm [shape: bf16[32,32], index: 3, kind: output, shape index: {}]  }
   0x1   :  { %9 = vsyncpa [#allocation6], 0 }
   0x2   :  { %10 = vsyncpa [#allocation4], 0  ;;  %s392_s12 = smov [#allocation2]   ;;  %s320_s16 = scalar_lea.hbm %s483_s0, 256 }
   0x3   :  { %s16_s13 = sshll.u32 %s392_s12, 4  ;;  %p321_p0 = scmp.ne.s32.totalorder %s483_s0, %s320_s16  ;;  %s17_s13 = int_to_ptr.vmem [resolvable:$true] %s16_s13 }
   0x4   :  { %p324_p1 = scmp.lt.u32.totalorder %s320_s16, %s483_s0 }
   0x6   :  { %p326_p2 = pnand %p324_p1, %p321_p0 }
   0x8   :  { %329 = shalt.err (!%p326_p2)
}
   0x9   :  { %s330_s21 = scalar_lea.vmem %s17_s13, 256  ;;  %p335_p4 = scmp.lt.s32.totalorder %s17_s13, %s17_s13 }
   0xa   :  { %p331_p3 = scmp.ne.s32.totalorder %s17_s13, %s330_s21  ;;  %p336_p5 = scmp.lt.s32.totalorder %s330_s21, %s330_s21 }
   0xc   :  { %p337_p6 = por %p336_p5, %p335_p4 }
   0xe   :  { %p338_p7 = pnand %p337_p6, %p331_p3 }
  0x10   :  { %341 = shalt.err (!%p338_p7)
}
  0x11   :  { %s393_s22 = smov 64   ;;  %s394_s23 = smov 4  }
  0x12   :  { %22 = dma.hbm_to_vmem [thread:$0]  %s483_s0, 256, %s17_s13, [#allocation3], %s393_s22, %s393_s22, %s394_s23  }
  0x13   :  { %s395_s26 = smov [#allocation5]   ;;  %s342_s30 = scalar_lea.hbm %s484_s1, 512 }
  0x14   :  { %s28_s27 = sshll.u32 %s395_s26, 4  ;;  %p343_p8 = scmp.ne.s32.totalorder %s484_s1, %s342_s30  ;;  %s29_s27 = int_to_ptr.vmem [resolvable:$true] %s28_s27 }
  0x15   :  { %p346_p9 = scmp.lt.u32.totalorder %s342_s30, %s484_s1 }
  0x17   :  { %p348_p10 = pnand %p346_p9, %p343_p8 }
  0x19   :  { %351 = shalt.err (!%p348_p10)
}
  0x1a   :  { %s352_s8 = scalar_lea.vmem %s29_s27, 512  ;;  %p357_p12 = scmp.lt.s32.totalorder %s29_s27, %s29_s27 }
  0x1b   :  { %p353_p11 = scmp.ne.s32.totalorder %s29_s27, %s352_s8  ;;  %p358_p13 = scmp.lt.s32.totalorder %s352_s8, %s352_s8 }
  0x1d   :  { %p359_p0 = por %p358_p13, %p357_p12 }
  0x1f   :  { %p360_p1 = pnand %p359_p0, %p353_p11 }
  0x21   :  { %363 = shalt.err (!%p360_p1)
}
  0x22   :  { %34 = dma.hbm_to_vmem [thread:$0]  %s484_s1, 512, %s29_s27, [#allocation6], %s393_s22, %s393_s22, %s394_s23  }
  0x23   :  { %386 = dma.done.wait [#allocation3], 256  }
  0x24   :  { %387 = vsyncadd [#allocation3], 4294967040 }
  0x25   :  { %388 = dma.done.wait [#allocation6], 512  }
  0x26   :  { %389 = vsyncadd [#allocation6], 4294966784  ;;  %v306_v0 = vld [vmem:[#allocation5] sm:$0xff]   ;;  %v307_v1 = vld [vmem:[#allocation5 + $0x8] sm:$0xff]   ;;  %vm95_vm0 = vcmask 523264   ;;  %vm241_vm1 = vcmask 257024  }
  0x27   :  { %289 = vmatprep.subr.bf16.mxu0 %v306_v0  ;;  %v308_v2 = vld [vmem:[#allocation5 + $0x10] sm:$0xff]   ;;  %v309_v4 = vld [vmem:[#allocation5 + $0x18] sm:$0xff]  }
  0x28   :  { %290 = vmatpush3.bf16.msra.mxu0 %v306_v0  ;;  %v310_v3 = vld [vmem:[#allocation2] sm:$0xff]   ;;  %v311_v5 = vld [vmem:[#allocation2 + $0x8] sm:$0xff]  }
  0x29   :  { %291 = vmatprep.subr.bf16.mxu0 %v307_v1  ;;  %297 = vmatprep.mubr.msk.bf16.mxu0 %vm95_vm0, %v310_v3  ;;  %v264_v6 = vld [vmem:[%s485_s2] ss:$0 sm:$0xff]  ;;  %v273_v54 = vld [vmem:[%s485_s2 + $0x1] ss:$0 sm:$0xff]  ;;  %v274_v58 = vld [vmem:[%s485_s2 + $0x2] ss:$0 sm:$0xff] }
  0x2a   :  { %s396_s2 = smov [#allocation7]  }
  0x2b   :  { %s251_s15 = sshll.u32 %s396_s2, 4  ;;  %s252_s15 = int_to_ptr.vmem [resolvable:$true] %s251_s15 }
  0x2c   :  { %292 = vmatpush3.bf16.msra.mxu0 %v307_v1  ;;  %s364_s16 = scalar_lea.vmem %s252_s15, 256  ;;  %p369_p3 = scmp.lt.s32.totalorder %s252_s15, %s252_s15 }
  0x2d   :  { %293 = vmatprep.subr.bf16.mxu0 %v308_v2  ;;  %p365_p2 = scmp.ne.s32.totalorder %s252_s15, %s364_s16  ;;  %p370_p4 = scmp.lt.s32.totalorder %s364_s16, %s364_s16 }
  0x2f   :  { %p371_p5 = por %p370_p4, %p369_p3 }
  0x30   :  { %294 = vmatpush3.bf16.msra.mxu0 %v308_v2 }
  0x31   :  { %295 = vmatprep.subr.bf16.mxu0 %v309_v4  ;;  %p372_p6 = pnand %p371_p5, %p365_p2 }
  0x34   :  { %296 = vmatpush3.bf16.msra.mxu0 %v309_v4 }
  0x37   :  { %298 = vmatmul.mubr.msk.bf16.vlgmr.msra.gmra.mrb[0].mxu0 %vm95_vm0, %v311_v5 }
 0x10a   :  { %v299_v7 = vpop.f32.mrb[0].mxu0 }
 0x10b   :  { %v450_v8 = vadd.f32 %v299_v7, %v264_v6  ;;  %v136_v9 = vpop.f32.mrb[1].mxu0 }
 0x10c   :  { %v137_v10 = vadd.f32 %v264_v6, %v136_v9  ;;  %v300_v11 = vpop.f32.mrb[2].mxu0 }
 0x10d   :  { %155 = vadd.xlane.f32.xlu1 %v450_v8  ;;  %v139_v12 = vpop.f32.mrb[3].mxu0  ;;  %v453_v13 = vadd.f32 %v300_v11, %v264_v6  ;;  %v161_v18 = vmul.f32 %v450_v8, %v450_v8 }
 0x10e   :  { %151 = vadd.xlane.f32.xlu0 %v137_v10  ;;  %v140_v14 = vadd.f32 %v264_v6, %v139_v12  ;;  %v159_v16 = vmul.f32 %v137_v10, %v137_v10 }
 0x10f   :  { %v162_v17 = vmul.f32 %v453_v13, %v453_v13 }
 0x110   :  { %v160_v15 = vmul.f32 %v140_v14, %v140_v14 }
 0x111   :  { %157 = vadd.xlane.f32.xlu1 %v453_v13 }
 0x112   :  { %153 = vadd.xlane.f32.xlu0 %v140_v14 }
 0x115   :  { %165 = vadd.xlane.f32.xlu1 %v160_v15 }
 0x116   :  { %163 = vadd.xlane.f32.xlu0 %v159_v16 }
 0x119   :  { %169 = vadd.xlane.f32.xlu1 %v162_v17 }
 0x11a   :  { %167 = vadd.xlane.f32.xlu0 %v161_v18 }
 0x19a   :  { %v156_v19 = vpop.xlane.xlu1 %155 }
 0x19b   :  { %v152_v20 = vpop.xlane.xlu0 %151  ;;  %v173_v30 = vmul.f32 0.03125, %v156_v19 }
 0x19c   :  { %v171_v23 = vmul.f32 0.03125, %v152_v20 }
 0x19d   :  { %v181_v40 = vmul.f32 %v173_v30, %v173_v30  ;;  %v201_v62 = vsub.f32 %v450_v8, %v173_v30 }
 0x19e   :  { %v158_v21 = vpop.xlane.xlu1 %157  ;;  %v179_v31 = vmul.f32 %v171_v23, %v171_v23  ;;  %v199_v53 = vsub.f32 %v137_v10, %v171_v23 }
 0x19f   :  { %v154_v22 = vpop.xlane.xlu0 %153  ;;  %v174_v27 = vmul.f32 0.03125, %v158_v21 }
 0x1a0   :  { %v172_v24 = vmul.f32 0.03125, %v154_v22 }
 0x1a1   :  { %v182_v36 = vmul.f32 %v174_v27, %v174_v27  ;;  %v202_v59 = vsub.f32 %v453_v13, %v174_v27 }
 0x1a2   :  { %v180_v25 = vmul.f32 %v172_v24, %v172_v24  ;;  %v166_v26 = vpop.xlane.xlu1 %165  ;;  %v200_v51 = vsub.f32 %v140_v14, %v172_v24 }
 0x1a3   :  { %v176_v28 = vmul.f32 0.03125, %v166_v26  ;;  %v164_v29 = vpop.xlane.xlu0 %163 }
 0x1a4   :  { %v175_v32 = vmul.f32 0.03125, %v164_v29 }
 0x1a5   :  { %v184_v33 = vsub.f32 %v176_v28, %v180_v25 }
 0x1a6   :  { %v183_v34 = vsub.f32 %v175_v32, %v179_v31  ;;  %v170_v35 = vpop.xlane.xlu1 %169 }
 0x1a7   :  { %v188_v37 = vmax.f32 %v184_v33, 0.0  ;;  %v178_v38 = vmul.f32 0.03125, %v170_v35  ;;  %v168_v39 = vpop.xlane.xlu0 %167 }
 0x1a8   :  { %v187_v41 = vmax.f32 %v183_v34, 0.0  ;;  %v177_v42 = vmul.f32 0.03125, %v168_v39 }
 0x1a9   :  { %v192_v43 = vadd.f32 1e-05, %v188_v37  ;;  %v186_v44 = vsub.f32 %v178_v38, %v182_v36 }
 0x1aa   :  { %v191_v45 = vadd.f32 1e-05, %v187_v41  ;;  %v185_v46 = vsub.f32 %v177_v42, %v181_v40 }
 0x1ab   :  { %312 = vrsqrt.f32 %v192_v43  ;;  %v190_v47 = vmax.f32 %v186_v44, 0.0 }
 0x1ac   :  { %314 = vrsqrt.f32 %v191_v45  ;;  %v189_v48 = vmax.f32 %v185_v46, 0.0 }
 0x1ad   :  { %v194_v49 = vadd.f32 1e-05, %v190_v47 }
 0x1ae   :  { %v193_v50 = vadd.f32 1e-05, %v189_v48 }
 0x1af   :  { %316 = vrsqrt.f32 %v194_v49 }
 0x1b0   :  { %318 = vrsqrt.f32 %v193_v50 }
 0x1b5   :  { %v313_v52 = vpop.eup %312 }
 0x1b6   :  { %v315_v55 = vpop.eup %314  ;;  %v204_v56 = vmul.f32 %v313_v52, %v200_v51 }
 0x1b7   :  { %v203_v57 = vmul.f32 %v315_v55, %v199_v53 }
 0x1b8   :  { %v213_v60 = vmul.f32 %v273_v54, %v204_v56 }
 0x1b9   :  { %v317_v61 = vpop.eup %316  ;;  %v212_v63 = vmul.f32 %v273_v54, %v203_v57 }
 0x1ba   :  { %v319_v0 = vpop.eup %318  ;;  %v206_v1 = vmul.f32 %v317_v61, %v202_v59  ;;  %v222_v2 = vadd.f32 %v274_v58, %v213_v60 }
 0x1bb   :  { %v205_v3 = vmul.f32 %v319_v0, %v201_v62  ;;  %v221_v4 = vadd.f32 %v274_v58, %v212_v63 }
 0x1bc   :  { %v215_v5 = vmul.f32 %v273_v54, %v206_v1  ;;  %v280_v6 = vpack.c.bf16 %v222_v2, %v222_v2 }
 0x1bd   :  { %v214_v7 = vmul.f32 %v273_v54, %v205_v3  ;;  %v279_v9 = vpack.c.bf16 %v221_v4, %v221_v4 }
 0x1be   :  { %v224_v10 = vadd.f32 %v274_v58, %v215_v5  ;;  %243 = vst.msk [vmem:[#allocation7 + $0x4] sm:$0xf] %vm241_vm1, %v280_v6 }
 0x1bf   :  { %v223_v11 = vadd.f32 %v274_v58, %v214_v7  ;;  %242 = vst.msk [vmem:[#allocation7] sm:$0xf] %vm241_vm1, %v279_v9 }
 0x1c0   :  { %v282_v12 = vpack.c.bf16 %v224_v10, %v224_v10 }
 0x1c1   :  { %v281_v13 = vpack.c.bf16 %v223_v11, %v223_v11 }
 0x1c2   :  { %245 = vst.msk [vmem:[#allocation7 + $0xc] sm:$0xf] %vm241_vm1, %v282_v12 }
 0x1c3   :  { %244 = vst.msk [vmem:[#allocation7 + $0x8] sm:$0xf] %vm241_vm1, %v281_v13 }
 0x1c4   :  { %375 = shalt.err (!%p372_p6)
}
 0x1c5   :  { %s376_s19 = scalar_lea.hbm %s486_s3, 256 }
 0x1c6   :  { %p377_p7 = scmp.ne.s32.totalorder %s486_s3, %s376_s19  ;;  %p380_p8 = scmp.lt.u32.totalorder %s376_s19, %s486_s3 }
 0x1c8   :  { %p382_p9 = pnand %p380_p8, %p377_p7 }
 0x1ca   :  { %385 = shalt.err (!%p382_p9)
}
 0x1cb   :  { %257 = dma.vmem_to_hbm [thread:$0]  %s252_s15, 256, %s486_s3, [#allocation4], %s393_s22, %s393_s22, %s394_s23  }
 0x1cc   :  { %390 = dma.done.wait [#allocation4], 256  }
 0x1cd   :  { %391 = vsyncadd [#allocation4], 4294967040 }
 0x1ce   :  { %261 = vsyncpa [#allocation3], 1 }
 0x1cf   :  { %262 = vsyncpa [#allocation6], 1 }
 0x1d0   :  { %263 = vsyncpa [#allocation4], 1 }

</bundles_post_ra>
